<compile_context>
chip_gen: v6e
topology: v6e:2x2x1
jax: 0.10.0
libtpu: 0.0.40
codegen_flags: <defaults>
</compile_context>

<pallas_src>
import functools

import jax
import jax.numpy as jnp
import numpy as np
from jax.experimental import pallas as pl
from jax.experimental.pallas import tpu as pltpu


def _round_up(x, m):
    return ((x + m - 1) // m) * m


def _cdiv(a, b):
    return (a + b - 1) // b


def _vmem_capacity_bytes():
    """Physical VMEM per core; conservative 64 MiB (v7x) fallback."""
    try:
        info = pltpu.get_tpu_info()
        for name in ("vmem_capacity_bytes", "vmem_size_bytes", "vmem_bytes"):
            cap = getattr(info, name, None)
            if cap:
                return int(cap)
    except Exception:
        pass
    return 64 * 1024 * 1024


def _tanh_dtype():
    """bf16 tanh on chips with a bf16 EUP (v6e/v7x); f32 on v5e and older."""
    try:
        kind = jax.devices()[0].device_kind.lower()
    except Exception:
        return jnp.float32
    if any(v in kind for v in ("v2", "v3", "v4", "v5")):
        return jnp.float32
    return jnp.bfloat16


def _bahdanau_kernel(dec_ref, enc_ref, wenc_ref, v_ref, out_ref, *,
                     batch, src_len, s_chunk, tanh_dtype):
    """One (batch-tile, S-chunk) grid step.

    dec_ref : (TB, Ho, 1)  f32   decoder projection + bias, as a column
    enc_ref : (TB, He, SC) bf16  transposed encoder chunk (S on lanes)
    wenc_ref: (Ho, He)     bf16  encoder half of the attn weight
    v_ref   : (Ho, 1)      f32   v weight (column)
    out_ref : (TB, S_pad)  f32   raw scores during the S sweep; the masked
                                 softmax of full rows is written on the last
                                 S chunk (block is resident across j).
    """
    i = pl.program_id(0)                      # batch tile
    j = pl.program_id(1)                      # S chunk
    n_s = pl.num_programs(1)
    tb = dec_ref.shape[0]
    s_pad = out_ref.shape[1]

    w = wenc_ref[...]                         # (Ho, He) bf16, hoisted
    v = v_ref[...]                            # (Ho, 1)  f32
    col0 = pl.multiple_of(j * s_chunk, 128)   # lane-aligned chunk offset

    def row_body(b, carry):
        # MXU: (Ho, He) @ (He, SC) -> (Ho, SC), f32 accumulate.
        proj = jnp.dot(w, enc_ref[b], preferred_element_type=jnp.float32)
        pre = proj + dec_ref[b]                               # + (Ho,1) bcast
        energy = jnp.tanh(pre.astype(tanh_dtype)).astype(jnp.float32)
        # v-contraction on the VPU/XLU (sublane reduce); MXU stays free.
        scores = jnp.sum(energy * v, axis=0, keepdims=True)   # (1, SC)
        out_ref[pl.ds(b, 1), pl.ds(col0, s_chunk)] = scores
        return carry

    if batch % tb == 0:
        # Every row of every tile is a real batch entry -> static trip count.
        jax.lax.fori_loop(0, tb, row_body, 0, unroll=(tb <= 8))
    else:
        # Last tile contains padding rows: skip them and keep them NaN-free.
        nvalid = jnp.minimum(tb, batch - i * tb)

        @pl.when((j == 0) & (nvalid < tb))
        def _():
            out_ref[...] = jnp.zeros_like(out_ref)

        jax.lax.fori_loop(0, nvalid, row_body, 0)

    # Last S chunk for this batch tile: masked, stable softmax over full rows.
    @pl.when(j == n_s - 1)
    def _():
        scores = out_ref[...]                                  # (TB, S_pad)
        if src_len < s_pad:
            lane = jax.lax.broadcasted_iota(jnp.int32, scores.shape, 1)
            scores = jnp.where(lane < src_len, scores, -jnp.inf)
        m = jnp.max(scores, axis=-1, keepdims=True)
        e = jnp.exp(scores - m)
        denom = jnp.sum(e, axis=-1, keepdims=True)
        out_ref[...] = e * pl.reciprocal(denom, approx=False)  # lane-dense


def prepare_encoder(encoder_outputs):
    """(B, S, He) float -> (B, He, S_pad) bf16, S padded to a multiple of 128.

    Decode-step invariant: compute once per source batch and reuse for every
    decoder step (this is the hoistable pre-pass the perf review flagged)."""
    B, S, He = encoder_outputs.shape
    S_pad = _round_up(S, 128)
    encT = jnp.swapaxes(encoder_outputs.astype(jnp.bfloat16), 1, 2)  # (B,He,S)
    if S_pad != S:
        encT = jnp.pad(encT, ((0, 0), (0, 0), (0, S_pad - S)))
    return encT


def bahdanau_attention_prepared(decoder_hidden, enc_prepared, src_len,
                                w_attn, b_attn, w_v):
    """decoder_hidden (B, Hd) f32, enc_prepared = prepare_encoder(enc) of
    shape (B, He, S_pad) bf16, src_len = true source length S.
    w_attn (Ho, Hd+He) [concat order: dec, enc], b_attn (Ho,), w_v (1, Ho).
    Returns (B, S) f32 softmax attention weights."""
    B, Hd = decoder_hidden.shape
    Bq, He, S_pad = enc_prepared.shape
    assert Bq == B
    Ho = w_attn.shape[0]
    S = int(src_len)
    assert 1 <= S <= S_pad, "src_len must be >= 1 (empty softmax row is NaN)"

    # --- split the concat-Linear: decoder half (+bias) stays in f32 XLA -----
    w_dec = w_attn[:, :Hd]                                      # (Ho, Hd)
    w_encT = w_attn[:, Hd:]                                     # (Ho, He)
    dec_proj = (decoder_hidden.astype(jnp.float32)
                @ w_dec.T.astype(jnp.float32)
                + b_attn.astype(jnp.float32))                   # (B, Ho)
    dec3 = dec_proj[:, :, None]                                 # (B, Ho, 1)
    wencT_bf16 = w_encT.astype(jnp.bfloat16)
    v_col = w_v.reshape(Ho, 1).astype(jnp.float32)

    # --- generation-aware VMEM budget & tile selection -----------------------
    cap = _vmem_capacity_bytes()
    budget = int(cap * 0.55)            # headroom for compiler scratch / misc
    vmem_limit = int(cap * 0.80)
    ho8 = _round_up(Ho, 8)

    def footprint(tb, sc):
        enc_b = 2 * tb * He * sc * 2                 # bf16 chunk, double-buffered
        dec_b = 2 * tb * ho8 * 128 * 4               # (Ho,1) column is lane-padded
        out_b = 2 * tb * S_pad * 4                   # resident score/output slab
        smax_b = 3 * tb * S_pad * 4                  # softmax temporaries
        inner_b = 4 * ho8 * sc * 4                   # per-row (Ho, SC) temporaries
        const_b = 2 * (ho8 * _round_up(He, 128) * 2 + ho8 * 128 * 4)
        return enc_b + dec_b + out_b + smax_b + inner_b + const_b

    # Batch tile: aim for >=2 (ideally 4+) grid steps on the "parallel" axis so
    # v7x megacore has work for both TensorCores; 8-row granularity (sublane
    # rule).  For B<=8 the batch axis cannot be split without pure-padding
    # tiles, so a single full-batch tile is used (S chunks still pipeline).
    if B <= 8:
        TB = B
    else:
        min_tiles = 4 if B >= 32 else 2
        TB = max(8, _round_up(_cdiv(B, min_tiles), 8))

    SC = S_pad
    while footprint(TB, SC) > budget and TB > 8:     # shrink batch tile first
        TB = max(8, _round_up(TB // 2, 8))
    while footprint(TB, SC) > budget and SC > 128:   # then stream S in chunks
        SC = max(128, _round_up(SC // 2, 128))
    while S_pad % SC != 0:                           # SC must tile S_pad exactly
        SC -= 128
    # TODO(synk): if even (TB=8, SC=128) exceeds the budget (enormous He),
    # stream He with manual make_async_copy; unreachable at sane model sizes.

    B_pad = _round_up(B, TB)
    if B_pad != B:
        dec3 = jnp.pad(dec3, ((0, B_pad - B), (0, 0), (0, 0)))
        enc_prepared = jnp.pad(enc_prepared, ((0, B_pad - B), (0, 0), (0, 0)))

    grid = (B_pad // TB, S_pad // SC)

    kernel = functools.partial(
        _bahdanau_kernel, batch=B, src_len=S, s_chunk=SC,
        tanh_dtype=_tanh_dtype())

    out = pl.pallas_call(
        kernel,
        out_shape=jax.ShapeDtypeStruct((B_pad, S_pad), jnp.float32),
        grid_spec=pltpu.PrefetchScalarGridSpec(
            num_scalar_prefetch=0,
            grid=grid,
            in_specs=[
                pl.BlockSpec((TB, Ho, 1), lambda i, j: (i, 0, 0)),    # dec col
                pl.BlockSpec((TB, He, SC), lambda i, j: (i, 0, j)),   # enc chunk
                pl.BlockSpec((Ho, He), lambda i, j: (0, 0)),          # W_enc
                pl.BlockSpec((Ho, 1), lambda i, j: (0, 0)),           # v col
            ],
            out_specs=pl.BlockSpec((TB, S_pad), lambda i, j: (i, 0)),
        ),
        compiler_params=pltpu.CompilerParams(
            dimension_semantics=("parallel", "arbitrary"),
            vmem_limit_bytes=vmem_limit,
        ),
    )(dec3, enc_prepared, wencT_bf16, v_col)

    return out[:B, :S]


def bahdanau_attention(decoder_hidden, encoder_outputs, w_attn, b_attn, w_v):
    """Convenience single-shot entry point.  In a decode loop, call
    prepare_encoder() once and bahdanau_attention_prepared() per step."""
    S = encoder_outputs.shape[1]
    enc_prepared = prepare_encoder(encoder_outputs)
    return bahdanau_attention_prepared(decoder_hidden, enc_prepared, S,
                                       w_attn, b_attn, w_v)


def bahdanau_reference(decoder_hidden, encoder_outputs, w_attn, b_attn, w_v):
    """Pure-JAX f32 reference mirroring the PyTorch forward exactly."""
    S = encoder_outputs.shape[1]
    dec_rep = jnp.repeat(decoder_hidden[:, None, :], S, axis=1)      # (B,S,Hd)
    cat = jnp.concatenate([dec_rep, encoder_outputs], axis=2)        # (B,S,Hd+He)
    energy = jnp.tanh(cat @ w_attn.T + b_attn)                       # (B,S,Ho)
    attention = (energy @ w_v.T)[..., 0]                             # (B,S)
    return jax.nn.softmax(attention, axis=1)


if __name__ == "__main__":
    B, S = 2, 8
    enc_hidden, dec_hidden = 48, 32
    Ho = dec_hidden

    key = jax.random.PRNGKey(0)
    k1, k2, k3, k4, k5 = jax.random.split(key, 5)

    decoder_hidden_x = jax.random.normal(k1, (B, dec_hidden), dtype=jnp.float32)
    encoder_outputs_x = jax.random.normal(k2, (B, S, enc_hidden), dtype=jnp.float32)

    # Deterministic synthetic parameters (shapes match nn.Linear in the module).
    in_dim = dec_hidden + enc_hidden   # concat order: (decoder_hidden, encoder_outputs)
    bound = 1.0 / np.sqrt(in_dim)
    w_attn = jax.random.uniform(k3, (Ho, in_dim), jnp.float32, -bound, bound)
    b_attn = jax.random.uniform(k4, (Ho,), jnp.float32, -bound, bound)
    w_v = jax.random.uniform(k5, (1, Ho), jnp.float32,
                             -1.0 / np.sqrt(Ho), 1.0 / np.sqrt(Ho))

    out = bahdanau_attention(decoder_hidden_x, encoder_outputs_x, w_attn, b_attn, w_v)
    out = jax.block_until_ready(out)

    ref = bahdanau_reference(decoder_hidden_x, encoder_outputs_x, w_attn, b_attn, w_v)
    # bf16 MXU operands (+ bf16 tanh on v6e/v7x) vs. the pure-f32 reference.
    np.testing.assert_allclose(np.asarray(out), np.asarray(ref), atol=1e-2, rtol=5e-2)
    # Softmax normalization stays in f32 -> rows still sum to ~1.
    np.testing.assert_allclose(np.asarray(out).sum(axis=1), np.ones(B), atol=1e-5)

    print("KERNEL_OK")
</pallas_src>

<mosaic_0001>
module attributes {stable_mosaic.version = 11 : i64} {
  func.func @_bahdanau_kernel(%arg0: i32, %arg1: i32, %arg2: memref<2x32x1xf32, #tpu.memory_space<vmem>>, %arg3: memref<2x48x128xbf16, #tpu.memory_space<vmem>>, %arg4: memref<32x48xbf16, #tpu.memory_space<vmem>>, %arg5: memref<32x1xf32, #tpu.memory_space<vmem>>, %arg6: memref<2x128xf32, #tpu.memory_space<vmem>>) attributes {dimension_semantics = [#tpu.dimension_semantics<parallel>, #tpu.dimension_semantics<arbitrary>], iteration_bounds = array<i64: 1, 1>, scalar_prefetch = 0 : i64, scratch_operands = 0 : i64, tpu.core_type = #tpu.core_type<tc>, window_params = [{transform_indices = @transform_0, window_bounds = array<i64: 2, 32, 1>}, {transform_indices = @transform_1, window_bounds = array<i64: 2, 48, 128>}, {pipeline_mode = #tpu.pipeline_mode<synchronous>, transform_indices = @transform_2, window_bounds = array<i64: 32, 48>}, {pipeline_mode = #tpu.pipeline_mode<synchronous>, transform_indices = @transform_3, window_bounds = array<i64: 32, 1>}, {transform_indices = @transform_4, window_bounds = array<i64: 2, 128>}]} {
    %c0 = arith.constant 0 : index
    %c0_0 = arith.constant 0 : index
    %0 = vector.load %arg4[%c0, %c0_0] : memref<32x48xbf16, #tpu.memory_space<vmem>>, vector<32x48xbf16>
    %c0_1 = arith.constant 0 : index
    %c0_2 = arith.constant 0 : index
    %1 = vector.load %arg5[%c0_1, %c0_2] : memref<32x1xf32, #tpu.memory_space<vmem>>, vector<32x1xf32>
    %c128_i32 = arith.constant 128 : i32
    %2 = arith.muli %arg1, %c128_i32 : i32
    %3 = tpu.assume_multiple %2, 128 : i32
    %c0_i32 = arith.constant 0 : i32
    %4 = arith.index_cast %c0_i32 : i32 to index
    %c0_3 = arith.constant 0 : index
    %c0_4 = arith.constant 0 : index
    %5 = vector.load %arg3[%4, %c0_3, %c0_4] : memref<2x48x128xbf16, #tpu.memory_space<vmem>>, vector<1x48x128xbf16>
    %6 = vector.shape_cast %5 : vector<1x48x128xbf16> to vector<48x128xbf16>
    %cst = arith.constant dense<0.000000e+00> : vector<32x128xf32>
    %7 = tpu.matmul %0, %6, %cst {dimension_numbers = #tpu.dot_dimension_numbers<[1], [0], [0], [1], [0, 0, 1, 1], [], []>} : vector<32x48xbf16>, vector<48x128xbf16>, vector<32x128xf32> -> vector<32x128xf32>
    %8 = arith.index_cast %c0_i32 : i32 to index
    %c0_5 = arith.constant 0 : index
    %c0_6 = arith.constant 0 : index
    %9 = vector.load %arg2[%8, %c0_5, %c0_6] : memref<2x32x1xf32, #tpu.memory_space<vmem>>, vector<1x32x1xf32>
    %10 = vector.shape_cast %9 : vector<1x32x1xf32> to vector<32x1xf32>
    %11 = vector.broadcast %10 : vector<32x1xf32> to vector<32x128xf32>
    %12 = arith.addf %7, %11 : vector<32x128xf32>
    %13 = arith.truncf %12 : vector<32x128xf32> to vector<32x128xbf16>
    %14 = math.tanh %13 : vector<32x128xbf16>
    %15 = arith.extf %14 : vector<32x128xbf16> to vector<32x128xf32>
    %16 = vector.broadcast %1 : vector<32x1xf32> to vector<32x128xf32>
    %17 = arith.mulf %15, %16 : vector<32x128xf32>
    %cst_7 = arith.constant dense<0.000000e+00> : vector<128xf32>
    %18 = vector.multi_reduction <add>, %17, %cst_7 [0] : vector<32x128xf32> to vector<128xf32>
    %19 = vector.shape_cast %18 : vector<128xf32> to vector<1x128xf32>
    %20 = arith.index_cast %c0_i32 : i32 to index
    %21 = arith.index_cast %3 : i32 to index
    %22 = vector.load %arg6[%20, %21] : memref<2x128xf32, #tpu.memory_space<vmem>>, vector<1x128xf32>
    tpu.vector_store %arg6[%20, %21], %19 {strides = array<i32>} : memref<2x128xf32, #tpu.memory_space<vmem>>, vector<1x128xf32>,
    %c1_i32 = arith.constant 1 : i32
    %23 = arith.index_cast %c1_i32 : i32 to index
    %c0_8 = arith.constant 0 : index
    %c0_9 = arith.constant 0 : index
    %24 = vector.load %arg3[%23, %c0_8, %c0_9] : memref<2x48x128xbf16, #tpu.memory_space<vmem>>, vector<1x48x128xbf16>
    %25 = vector.shape_cast %24 : vector<1x48x128xbf16> to vector<48x128xbf16>
    %cst_10 = arith.constant dense<0.000000e+00> : vector<32x128xf32>
    %26 = tpu.matmul %0, %25, %cst_10 {dimension_numbers = #tpu.dot_dimension_numbers<[1], [0], [0], [1], [0, 0, 1, 1], [], []>} : vector<32x48xbf16>, vector<48x128xbf16>, vector<32x128xf32> -> vector<32x128xf32>
    %27 = arith.index_cast %c1_i32 : i32 to index
    %c0_11 = arith.constant 0 : index
    %c0_12 = arith.constant 0 : index
    %28 = vector.load %arg2[%27, %c0_11, %c0_12] : memref<2x32x1xf32, #tpu.memory_space<vmem>>, vector<1x32x1xf32>
    %29 = vector.shape_cast %28 : vector<1x32x1xf32> to vector<32x1xf32>
    %30 = vector.broadcast %29 : vector<32x1xf32> to vector<32x128xf32>
    %31 = arith.addf %26, %30 : vector<32x128xf32>
    %32 = arith.truncf %31 : vector<32x128xf32> to vector<32x128xbf16>
    %33 = math.tanh %32 : vector<32x128xbf16>
    %34 = arith.extf %33 : vector<32x128xbf16> to vector<32x128xf32>
    %35 = vector.broadcast %1 : vector<32x1xf32> to vector<32x128xf32>
    %36 = arith.mulf %34, %35 : vector<32x128xf32>
    %cst_13 = arith.constant dense<0.000000e+00> : vector<128xf32>
    %37 = vector.multi_reduction <add>, %36, %cst_13 [0] : vector<32x128xf32> to vector<128xf32>
    %38 = vector.shape_cast %37 : vector<128xf32> to vector<1x128xf32>
    %39 = arith.index_cast %c1_i32 : i32 to index
    %40 = arith.index_cast %3 : i32 to index
    %41 = vector.load %arg6[%39, %40] : memref<2x128xf32, #tpu.memory_space<vmem>>, vector<1x128xf32>
    tpu.vector_store %arg6[%39, %40], %38 {strides = array<i32>} : memref<2x128xf32, #tpu.memory_space<vmem>>, vector<1x128xf32>,
    %c2_i32 = arith.constant 2 : i32
    %c0_i32_14 = arith.constant 0 : i32
    %42 = arith.cmpi eq, %arg1, %c0_i32_14 : i32
    %43 = arith.extui %42 : i1 to i32
    %c0_i32_15 = arith.constant 0 : i32
    %44 = arith.cmpi ne, %43, %c0_i32_15 : i32
    scf.if %44 {
      %c0_16 = arith.constant 0 : index
      %c0_17 = arith.constant 0 : index
      %45 = vector.load %arg6[%c0_16, %c0_17] : memref<2x128xf32, #tpu.memory_space<vmem>>, vector<2x128xf32>
      %46 = tpu.iota {dimensions = array<i32: 1>} : vector<2x128xi32>
      %c8_i32 = arith.constant 8 : i32
      %47 = vector.broadcast %c8_i32 : i32 to vector<2x128xi32>
      %48 = arith.cmpi slt, %46, %47 : vector<2x128xi32>
      %cst_18 = arith.constant 0xFF800000 : f32
      %49 = vector.broadcast %cst_18 : f32 to vector<2x128xf32>
      %50 = arith.select %48, %45, %49 : vector<2x128xi1>, vector<2x128xf32>
      %cst_19 = arith.constant dense<0xFF800000> : vector<2xf32>
      %51 = vector.multi_reduction <maximumf>, %50, %cst_19 [1] : vector<2x128xf32> to vector<2xf32>
      %52 = vector.shape_cast %51 : vector<2xf32> to vector<2x1xf32>
      %53 = vector.broadcast %52 : vector<2x1xf32> to vector<2x128xf32>
      %54 = arith.subf %50, %53 : vector<2x128xf32>
      %55 = math.exp %54 : vector<2x128xf32>
      %cst_20 = arith.constant dense<0.000000e+00> : vector<2xf32>
      %56 = vector.multi_reduction <add>, %55, %cst_20 [1] : vector<2x128xf32> to vector<2xf32>
      %57 = vector.shape_cast %56 : vector<2xf32> to vector<2x1xf32>
      %58 = tpu.reciprocal %57 : vector<2x1xf32> -> vector<2x1xf32>
      %59 = vector.broadcast %58 : vector<2x1xf32> to vector<2x128xf32>
      %60 = arith.mulf %55, %59 : vector<2x128xf32>
      %c0_21 = arith.constant 0 : index
      %c0_22 = arith.constant 0 : index
      %61 = vector.load %arg6[%c0_21, %c0_22] : memref<2x128xf32, #tpu.memory_space<vmem>>, vector<2x128xf32>
      tpu.vector_store %arg6[%c0_21, %c0_22], %60 {strides = array<i32>} : memref<2x128xf32, #tpu.memory_space<vmem>>, vector<2x128xf32>,
    } else {
    }
    return
  }
  func.func @transform_0(%arg0: i32, %arg1: i32) -> (i32, i32, i32) {
    %c0_i32 = arith.constant 0 : i32
    %c0_i32_0 = arith.constant 0 : i32
    %c0_i32_1 = arith.constant 0 : i32
    return %arg0, %c0_i32, %c0_i32_0 : i32, i32, i32
  }
  func.func @transform_1(%arg0: i32, %arg1: i32) -> (i32, i32, i32) {
    %c0_i32 = arith.constant 0 : i32
    %c0_i32_0 = arith.constant 0 : i32
    return %arg0, %c0_i32, %arg1 : i32, i32, i32
  }
  func.func @transform_2(%arg0: i32, %arg1: i32) -> (i32, i32) {
    %c0_i32 = arith.constant 0 : i32
    %c0_i32_0 = arith.constant 0 : i32
    %c0_i32_1 = arith.constant 0 : i32
    return %c0_i32, %c0_i32_0 : i32, i32
  }
  func.func @transform_3(%arg0: i32, %arg1: i32) -> (i32, i32) {
    %c0_i32 = arith.constant 0 : i32
    %c0_i32_0 = arith.constant 0 : i32
    %c0_i32_1 = arith.constant 0 : i32
    return %c0_i32, %c0_i32_0 : i32, i32
  }
  func.func @transform_4(%arg0: i32, %arg1: i32) -> (i32, i32) {
    %c0_i32 = arith.constant 0 : i32
    %c0_i32_0 = arith.constant 0 : i32
    return %arg0, %c0_i32 : i32, i32
  }
}

</mosaic_0001>

<bundles_post_ra>
// kernel: tpu_custom_call.1
= control target key start
LH: loop header
LB: loop body
LE: loop exit
PB: predicated region body
PF: predicated region fallthrough
CT: control target
= control target key end

     0   :  { %v443_v3 = vmov 0   ;;  %vm86_vm0 = vcmask 392192   ;;  %s537_s0 = inlined_call_operand.vmem [shape: f32[2,32,1], index: 0, kind: input, shape index: {}]   ;;  %s538_s1 = inlined_call_operand.vmem [shape: bf16[2,48,128], index: 1, kind: input, shape index: {}]   ;;  %s539_s2 = inlined_call_operand.vmem [shape: bf16[32,48], index: 2, kind: input, shape index: {}]   ;;  %s540_s3 = inlined_call_operand.vmem [shape: f32[32,1], index: 3, kind: input, shape index: {}]   ;;  %s541_s4 = inlined_call_operand.hbm [shape: f32[2,128], index: 4, kind: output, shape index: {}]  }
   0x1   :  { %v401_v0 = vld [vmem:[%s538_s1 + $0x10] sm:$0xff]   ;;  %v402_v1 = vld [vmem:[%s538_s1 + $0x28] sm:$0xff]   ;;  %400 = vset.pattern.permute.xlu1 %v443_v3  ;;  %v404_v4 = vld [vmem:[%s538_s1 + $0x20] sm:$0xff]   ;;  %399 = vset.pattern.permute.xlu0 %v443_v3 }
   0x2   :  { %377 = vmatprep.subr.bf16.mxu0 %v401_v0  ;;  %v403_v2 = vld [vmem:[%s538_s1 + $0x8] sm:$0xff]   ;;  %387 = vmatprep.subr.bf16.mxu1 %v402_v1  ;;  %v405_v5 = vld [vmem:[%s538_s1] sm:$0xff]   ;;  %v406_v6 = vld [vmem:[%s538_s1 + $0x18] sm:$0xff]  }
   0x3   :  { %378 = vmatpush3.bf16.msra.mxu0 %v401_v0  ;;  %388 = vmatpush3.bf16.msra.mxu1 %v402_v1  ;;  %v407_v7 = vld [vmem:[%s539_s2] sm:$0xff]   ;;  %v408_v10 = vld [vmem:[%s539_s2 + $0x8] sm:$0xff]  }
   0x4   :  { %379 = vmatprep.subr.bf16.mxu0 %v403_v2  ;;  %389 = vmatprep.subr.bf16.mxu1 %v404_v4  ;;  %v358_v8 = vld [vmem:[%s537_s0 + $0x20] sm:$0xff]  ;;  %v359_v11 = vld [vmem:[%s537_s0 + $0x28] sm:$0xff] }
   0x5   :  { %v34_v9 = vld [vmem:[%s537_s0] sm:$0xff]  ;;  %383 = vmatprep.mubr.msk.bf16.mxu0 %vm86_vm0, %v407_v7  ;;  %393 = vmatprep.mubr.msk.bf16.mxu1 %vm86_vm0, %v407_v7  ;;  %v35_v12 = vld [vmem:[%s537_s0 + $0x8] sm:$0xff] }
   0x6   :  { %201 = vperm.xlu1 %400, %v358_v8   ;;  %40 = vperm.xlu0 %399, %v34_v9  }
   0x7   :  { %380 = vmatpush3.bf16.msra.mxu0 %v403_v2  ;;  %390 = vmatpush3.bf16.msra.mxu1 %v404_v4 }
   0x8   :  { %381 = vmatprep.subr.bf16.mxu0 %v405_v5  ;;  %391 = vmatprep.subr.bf16.mxu1 %v406_v6 }
   0xb   :  { %382 = vmatpush3.bf16.msra.mxu0 %v405_v5  ;;  %392 = vmatpush3.bf16.msra.mxu1 %v406_v6 }
   0xc   :  { %9 = vsyncpa [#allocation3], 0  ;;  %206 = vperm.xlu1 %400, %v359_v11   ;;  %45 = vperm.xlu0 %399, %v35_v12   ;;  %v37_v13 = vld [vmem:[%s537_s0 + $0x18] sm:$0xff]  ;;  %v36_v14 = vld [vmem:[%s537_s0 + $0x10] sm:$0xff]  ;;  %vm317_vm2 = vcmask 1041408  }
   0xd   :  { %v361_v15 = vld [vmem:[%s537_s0 + $0x38] sm:$0xff]  ;;  %v360_v16 = vld [vmem:[%s537_s0 + $0x30] sm:$0xff]  ;;  %v24_v17 = vld [vmem:[%s540_s3 + $0x8] sm:$0xff]  ;;  %s444_s0 = smov [#allocation2]  }
   0xe   :  { %384 = vmatmul.mubr.msk.bf16.vlgmr.msra.gmra.mxu0 %vm86_vm0, %v408_v10  ;;  %394 = vmatmul.mubr.msk.bf16.vlgmr.msra.gmra.mxu1 %vm86_vm0, %v408_v10  ;;  %v23_v18 = vld [vmem:[%s540_s3] sm:$0xff]  ;;  %v26_v19 = vld [vmem:[%s540_s3 + $0x18] sm:$0xff]  ;;  %v25_v20 = vld [vmem:[%s540_s3 + $0x10] sm:$0xff]  ;;  %s336_s3 = sshll.u32 %s444_s0, 4  ;;  %s337_s3 = int_to_ptr.vmem [resolvable:$true] %s336_s3 }
   0xf   :  { %s421_s27 = scalar_lea.vmem %s337_s3, 32  ;;  %p426_p1 = scmp.lt.s32.totalorder %s337_s3, %s337_s3 }
  0x10   :  { %55 = vperm.xlu1 %400, %v37_v13   ;;  %50 = vperm.xlu0 %399, %v36_v14   ;;  %p422_p0 = scmp.ne.s32.totalorder %s337_s3, %s421_s27  ;;  %p427_p2 = scmp.lt.s32.totalorder %s421_s27, %s421_s27 }
  0x12   :  { %p428_p3 = por %p427_p2, %p426_p1 }
  0x14   :  { %216 = vperm.xlu1 %400, %v361_v15   ;;  %211 = vperm.xlu0 %399, %v360_v16   ;;  %p429_p4 = pnand %p428_p3, %p422_p0 }
  0x18   :  { %157 = vperm.xlu1 %400, %v24_v17   ;;  %152 = vperm.xlu0 %399, %v23_v18  }
  0x1c   :  { %167 = vperm.xlu1 %400, %v26_v19   ;;  %162 = vperm.xlu0 %399, %v25_v20  }
  0x81   :  { %v202_v21 = vpop.permute.xlu1 %201  ;;  %v41_v22 = vpop.permute.xlu0 %40 }
  0x87   :  { %v207_v23 = vpop.permute.xlu1 %206  ;;  %v46_v24 = vpop.permute.xlu0 %45 }
  0x8b   :  { %v56_v25 = vpop.permute.xlu1 %55  ;;  %v51_v26 = vpop.permute.xlu0 %50 }
  0x8f   :  { %v217_v31 = vpop.permute.xlu1 %216  ;;  %v212_v33 = vpop.permute.xlu0 %211 }
  0x93   :  { %v153_v50 = vpop.permute.xlu0 %152  ;;  %v158_v53 = vpop.permute.xlu1 %157 }
  0x97   :  { %v163_v0 = vpop.permute.xlu0 %162  ;;  %v168_v6 = vpop.permute.xlu1 %167 }
  0xce   :  { %v385_v27 = vpop.f32.mrf.mxu0  ;;  %v395_v28 = vpop.f32.mrf.mxu1 }
  0xcf   :  { %v136_v34 = vadd.f32 %v385_v27, %v51_v26  ;;  %v280_v37 = vadd.f32 %v395_v28, %v212_v33  ;;  %v313_v26 = vlaneseq }
  0xd0   :  { %v127_v29 = vpop.f32.mrf.mxu0  ;;  %v271_v30 = vpop.f32.mrf.mxu1 }
  0xd1   :  { %v128_v40 = vadd.f32 %v127_v29, %v41_v22  ;;  %v272_v44 = vadd.f32 %v271_v30, %v202_v21  ;;  %v314_v28 = vand.u32 127, %v313_v26 }
  0xd2   :  { %v386_v32 = vpop.f32.mrf.mxu0  ;;  %v396_v36 = vpop.f32.mrf.mxu1 }
  0xd3   :  { %v139_v35 = vadd.f32 %v386_v32, %v56_v25  ;;  %v283_v38 = vadd.f32 %v396_v36, %v217_v31  ;;  %vm315_vm1 = vcmp.lt.s32.totalorder %v314_v28, 8 }
  0xd4   :  { %v130_v39 = vpop.f32.mrf.mxu0  ;;  %v274_v43 = vpop.f32.mrf.mxu1 }
  0xd5   :  { %v143_v41 = vpack.c.bf16 %v139_v35, %v136_v34  ;;  %v131_v42 = vadd.f32 %v130_v39, %v46_v24  ;;  %v287_v45 = vpack.c.bf16 %v283_v38, %v280_v37  ;;  %v275_v46 = vadd.f32 %v274_v43, %v207_v23 }
  0xd7   :  { %409 = vtanh.bf16 %v143_v41  ;;  %v142_v47 = vpack.c.bf16 %v131_v42, %v128_v40  ;;  %v286_v48 = vpack.c.bf16 %v275_v46, %v272_v44 }
  0xd8   :  { %411 = vtanh.bf16 %v287_v45 }
  0xd9   :  { %413 = vtanh.bf16 %v142_v47 }
  0xda   :  { %415 = vtanh.bf16 %v286_v48 }
  0xe5   :  { %v410_v49 = vpop.eup %409 }
  0xe6   :  { %v412_v51 = vpop.eup %411  ;;  %v148_v55 = vunpack.c.l.bf16 %v410_v49  ;;  %v149_v61 = vunpack.c.h.bf16 %v410_v49 }
  0xe7   :  { %v414_v52 = vpop.eup %413  ;;  %v292_v58 = vunpack.c.l.bf16 %v412_v51  ;;  %v293_v1 = vunpack.c.h.bf16 %v412_v51 }
  0xe8   :  { %v416_v54 = vpop.eup %415  ;;  %v146_v56 = vunpack.c.l.bf16 %v414_v52  ;;  %v147_v57 = vunpack.c.h.bf16 %v414_v52  ;;  %v172_v4 = vmul.f32 %v163_v0, %v148_v55  ;;  %v173_v9 = vmul.f32 %v168_v6, %v149_v61 }
  0xe9   :  { %v290_v59 = vunpack.c.l.bf16 %v416_v54  ;;  %v291_v60 = vunpack.c.h.bf16 %v416_v54  ;;  %v296_v7 = vmul.f32 %v292_v58, %v163_v0  ;;  %v297_v11 = vmul.f32 %v293_v1, %v168_v6 }
  0xea   :  { %v170_v62 = vmul.f32 %v153_v50, %v146_v56  ;;  %v171_v63 = vmul.f32 %v158_v53, %v147_v57 }
  0xeb   :  { %v294_v2 = vmul.f32 %v290_v59, %v153_v50  ;;  %v295_v3 = vmul.f32 %v291_v60, %v158_v53 }
  0xec   :  { %v174_v5 = vadd.f32 %v171_v63, %v170_v62 }
  0xed   :  { %v298_v8 = vadd.f32 %v295_v3, %v294_v2 }
  0xee   :  { %v175_v10 = vadd.f32 %v174_v5, %v172_v4 }
  0xef   :  { %v299_v12 = vadd.f32 %v298_v8, %v296_v7 }
  0xf0   :  { %v176_v13 = vadd.f32 %v175_v10, %v173_v9 }
  0xf1   :  { %v300_v14 = vadd.f32 %v299_v12, %v297_v11 }
  0xf2   :  { %v177_v15 = vrot.slane %v176_v13, 4 }
  0xf3   :  { %v301_v16 = vrot.slane %v300_v14, 4 }
  0xf4   :  { %v178_v17 = vadd.f32 %v177_v15, %v176_v13 }
  0xf5   :  { %v302_v18 = vadd.f32 %v301_v16, %v300_v14 }
  0xf6   :  { %v179_v19 = vrot.slane %v178_v17, 2 }
  0xf7   :  { %v303_v20 = vrot.slane %v302_v18, 2 }
  0xf8   :  { %v180_v21 = vadd.f32 %v179_v19, %v178_v17 }
  0xf9   :  { %v304_v22 = vadd.f32 %v303_v20, %v302_v18 }
  0xfa   :  { %v181_v23 = vrot.slane %v180_v21, 1 }
  0xfb   :  { %v305_v24 = vrot.slane %v304_v22, 1 }
  0xfc   :  { %v182_v25 = vadd.f32 %v181_v23, %v180_v21 }
  0xfd   :  { %v306_v27 = vadd.f32 %v305_v24, %v304_v22 }
  0xfe   :  { %186 = vst [vmem:[#allocation2] sm:$0x1] %v182_v25 }
  0xff   :  { %307 = vst [vmem:[#allocation2 + $0x1] sm:$0x1] %v306_v27 }
 0x106   :  { %v312_v29 = vld [vmem:[#allocation2] sm:$0x3] }
 0x107   :  { %v316_v30 = vsel %vm315_vm1, %v312_v29, -inf }
 0x108   :  { %v318_v31 = vsel %vm317_vm2, %v316_v30, -inf }
 0x109   :  { %319 = vmax.xlane.f32.xlu0 %v318_v31 }
 0x192   :  { %v320_v32 = vpop.xlane.xlu0 %319 }
 0x193   :  { %v321_v33 = vsub.f32 %v316_v30, %v320_v32 }
 0x195   :  { %v322_v34 = vmul.f32 1.442695, %v321_v33 }
 0x197   :  { %417 = vpow2.f32 %v322_v34 }
 0x1a4   :  { %v418_v35 = vpop.eup %417 }
 0x1a5   :  { %v324_v36 = vsel %vm317_vm2, %v418_v35, 0.0 }
 0x1a6   :  { %325 = vadd.xlane.f32.xlu1 %v324_v36 }
 0x22f   :  { %v326_v37 = vpop.xlane.xlu1 %325 }
 0x230   :  { %419 = vrcp.f32 %v326_v37 }
 0x23d   :  { %v420_v38 = vpop.eup %419 }
 0x23e   :  { %v328_v39 = vmul.f32 %v420_v38, %v418_v35 }
 0x240   :  { %329 = vst [vmem:[#allocation2] sm:$0x3] %v328_v39 }
 0x241   :  { %432 = shalt.err (!%p429_p4)
}
 0x242   :  { %339 = dma.vmem_to_hbm [thread:$0]  %s337_s3, 32, %s541_s4, [#allocation3]  }
 0x243   :  { %441 = dma.done.wait [#allocation3], 32  }
 0x244   :  { %442 = vsyncadd [#allocation3], 4294967264 }
 0x245   :  { %343 = vsyncpa [#allocation3], 1 }

</bundles_post_ra>
